<compile_context>
chip_gen: v6e
topology: v6e:2x2x1
jax: 0.10.0
libtpu: 0.0.40
codegen_flags: <defaults>
</compile_context>

<pallas_src>
import functools

import jax
import jax.numpy as jnp
from jax.experimental import pallas as pl
from jax.experimental.pallas import tpu as pltpu


def _ce2d_kernel(feat_ref, tgt_ref, out_ref, *, ignore):
    """One (batch, hw-tile) block.

    feat_ref : (1, C, TILE_HW)  logits (any float dtype; upcast to f32 in-kernel)
    tgt_ref  : (1, 1, TILE_HW)  int32 targets
    out_ref  : (1, 1, TILE_HW)  f32 per-pixel loss (0 where invalid/ignored)
    """
    logits = feat_ref[0].astype(jnp.float32)          # (C, TH), pixels on lanes
    tgt = tgt_ref[0]                                   # (1, TH) int32

    # log-sum-exp over the class (sublane) axis
    m = jnp.max(logits, axis=0, keepdims=True)                          # (1, TH)
    lse = m + jnp.log(jnp.sum(jnp.exp(logits - m), axis=0, keepdims=True))

    # gather logit at the target class via a one-hot compare (no OOB for
    # ignore/negative labels: they simply match no class row).
    cls = jax.lax.broadcasted_iota(jnp.int32, logits.shape, 0)           # (C, TH)
    picked = jnp.sum(jnp.where(cls == tgt, logits, 0.0),
                     axis=0, keepdims=True)                              # (1, TH)

    loss = lse - picked                                # = -log_softmax[target]
    valid = jnp.logical_and(tgt >= 0, tgt != ignore)
    loss = jnp.where(valid, loss, 0.0)

    out_ref[...] = loss[None].astype(out_ref.dtype)    # (1, 1, TH)


def cross_entropy_2d_map(predict, target, *, ignore_label=255, tile_hw=None):
    """Dense per-pixel loss map (N, H, W) and validity mask (N, H, W).

    Invalid / ignored pixels get loss 0 and mask False.
    """
    n, c, h, w = predict.shape
    assert target.shape == (n, h, w)
    hw = h * w

    if tile_hw is None:
        # lane-dense tile; (C padded to 8k sublanes) * 8192 lanes * 4 B * 2 buffers
        # is only a few MiB -> comfortably inside VMEM on v5e/v6e/v7x.
        tile_hw = min(8 * 1024, pl.cdiv(hw, 128) * 128)
    hw_pad = pl.cdiv(hw, tile_hw) * tile_hw

    feat = predict.reshape(n, c, hw)                      # free reshape of NCHW
    tgt = target.reshape(n, 1, hw).astype(jnp.int32)      # lane-dense targets
    if hw_pad != hw:
        feat = jnp.pad(feat, ((0, 0), (0, 0), (0, hw_pad - hw)))
        tgt = jnp.pad(tgt, ((0, 0), (0, 0), (0, hw_pad - hw)),
                      constant_values=ignore_label)       # padding -> ignored

    kernel = functools.partial(_ce2d_kernel, ignore=int(ignore_label))

    loss = pl.pallas_call(
        kernel,
        out_shape=jax.ShapeDtypeStruct((n, 1, hw_pad), jnp.float32),
        grid=(n, hw_pad // tile_hw),
        in_specs=[
            pl.BlockSpec((1, c, tile_hw), lambda b, t: (b, 0, t)),
            pl.BlockSpec((1, 1, tile_hw), lambda b, t: (b, 0, t)),
        ],
        out_specs=pl.BlockSpec((1, 1, tile_hw), lambda b, t: (b, 0, t)),
        compiler_params=pltpu.CompilerParams(
            dimension_semantics=("parallel", "parallel"),
            vmem_limit_bytes=32 * 1024 * 1024,
        ),
    )(feat, tgt)

    loss_map = loss[:, 0, :hw].reshape(n, h, w)
    valid = jnp.logical_and(target >= 0, target != ignore_label)
    return loss_map, valid


def cross_entropy_2d(predict, target, weight=None, *, ignore_label=255):
    """Matches CrossEntropy2D(reduction='none').forward: 1-D losses at valid pixels.

    NOTE: uses eager boolean indexing for the ragged gather, so call it
    outside jit (the dense map + mask from cross_entropy_2d_map is jittable).
    """
    # TODO(synk): per-class `weight` rescaling not implemented (weight=None path only).
    assert weight is None
    loss_map, valid = cross_entropy_2d_map(predict, target, ignore_label=ignore_label)
    return loss_map.reshape(-1)[valid.reshape(-1)]


def _reference_loss(predict, target, ignore_label=255):
    """Pure-JAX mirror of the PyTorch forward (weight=None, reduction='none')."""
    n, c, h, w = predict.shape
    mask = jnp.logical_and(target >= 0, target != ignore_label).reshape(-1)
    pred = jnp.transpose(predict, (0, 2, 3, 1)).reshape(-1, c)
    tgt = target.reshape(-1)
    pred_v = pred[mask]           # eager boolean gather (concrete arrays)
    tgt_v = tgt[mask]
    log_p = jax.nn.log_softmax(pred_v.astype(jnp.float32), axis=-1)
    return -jnp.take_along_axis(log_p, tgt_v[:, None].astype(jnp.int32), axis=1)[:, 0]


if __name__ == "__main__":
    num_classes = 19
    ignore = 255
    batch, H, W = 2, 16, 16

    key = jax.random.PRNGKey(0)
    k_feat, k_tgt, k_ign, k_neg = jax.random.split(key, 4)

    predict = jax.random.normal(k_feat, (batch, num_classes, H, W), jnp.float32)
    target = jax.random.randint(k_tgt, (batch, H, W), 0, num_classes, jnp.int32)
    # exercise both mask conditions: ignore_label pixels and negative labels
    ign_mask = jax.random.uniform(k_ign, (batch, H, W)) < 0.10
    target = jnp.where(ign_mask, jnp.int32(ignore), target)
    neg_mask = jax.random.uniform(k_neg, (batch, H, W)) < 0.05
    target = jnp.where(neg_mask, jnp.int32(-1), target)

    loss_map, valid = cross_entropy_2d_map(predict, target, ignore_label=ignore)
    loss_map = jax.block_until_ready(loss_map)

    out = cross_entropy_2d(predict, target, ignore_label=ignore)
    ref = jax.block_until_ready(_reference_loss(predict, target, ignore_label=ignore))

    assert out.shape == ref.shape, (out.shape, ref.shape)
    assert jnp.max(jnp.abs(out - ref)) < 1e-4, float(jnp.max(jnp.abs(out - ref)))
    # ignored / negative pixels must contribute zero loss in the dense map
    assert jnp.all(jnp.where(valid, 0.0, loss_map) == 0.0)

    print("KERNEL_OK")
</pallas_src>

<mosaic_0001>
module attributes {stable_mosaic.version = 11 : i64} {
  func.func @_ce2d_kernel(%arg0: i32, %arg1: i32, %arg2: memref<1x19x256xf32, #tpu.memory_space<vmem>>, %arg3: memref<1x1x256xi32, #tpu.memory_space<vmem>>, %arg4: memref<1x1x256xf32, #tpu.memory_space<vmem>>) attributes {dimension_semantics = [#tpu.dimension_semantics<parallel>, #tpu.dimension_semantics<parallel>], iteration_bounds = array<i64: 2, 1>, scalar_prefetch = 0 : i64, scratch_operands = 0 : i64, tpu.core_type = #tpu.core_type<tc>, window_params = [{transform_indices = @transform_0, window_bounds = array<i64: 1, 19, 256>}, {transform_indices = @transform_1, window_bounds = array<i64: 1, 1, 256>}, {transform_indices = @transform_2, window_bounds = array<i64: 1, 1, 256>}]} {
    %c0 = arith.constant 0 : index
    %c0_0 = arith.constant 0 : index
    %c0_1 = arith.constant 0 : index
    %0 = vector.load %arg2[%c0, %c0_0, %c0_1] : memref<1x19x256xf32, #tpu.memory_space<vmem>>, vector<1x19x256xf32>
    %1 = vector.shape_cast %0 : vector<1x19x256xf32> to vector<19x256xf32>
    %c0_2 = arith.constant 0 : index
    %c0_3 = arith.constant 0 : index
    %c0_4 = arith.constant 0 : index
    %2 = vector.load %arg3[%c0_2, %c0_3, %c0_4] : memref<1x1x256xi32, #tpu.memory_space<vmem>>, vector<1x1x256xi32>
    %3 = vector.shape_cast %2 : vector<1x1x256xi32> to vector<1x256xi32>
    %cst = arith.constant dense<0xFF800000> : vector<256xf32>
    %4 = vector.multi_reduction <maximumf>, %1, %cst [0] : vector<19x256xf32> to vector<256xf32>
    %5 = vector.shape_cast %4 : vector<256xf32> to vector<1x256xf32>
    %6 = vector.broadcast %5 : vector<1x256xf32> to vector<19x256xf32>
    %7 = arith.subf %1, %6 : vector<19x256xf32>
    %8 = math.exp %7 : vector<19x256xf32>
    %cst_5 = arith.constant dense<0.000000e+00> : vector<256xf32>
    %9 = vector.multi_reduction <add>, %8, %cst_5 [0] : vector<19x256xf32> to vector<256xf32>
    %10 = vector.shape_cast %9 : vector<256xf32> to vector<1x256xf32>
    %11 = math.log %10 : vector<1x256xf32>
    %12 = arith.addf %5, %11 : vector<1x256xf32>
    %13 = tpu.iota {dimensions = array<i32: 0>} : vector<19x256xi32>
    %14 = vector.broadcast %3 : vector<1x256xi32> to vector<19x256xi32>
    %15 = arith.cmpi eq, %13, %14 : vector<19x256xi32>
    %cst_6 = arith.constant 0.000000e+00 : f32
    %16 = vector.broadcast %cst_6 : f32 to vector<19x256xf32>
    %17 = arith.select %15, %1, %16 : vector<19x256xi1>, vector<19x256xf32>
    %cst_7 = arith.constant dense<0.000000e+00> : vector<256xf32>
    %18 = vector.multi_reduction <add>, %17, %cst_7 [0] : vector<19x256xf32> to vector<256xf32>
    %19 = vector.shape_cast %18 : vector<256xf32> to vector<1x256xf32>
    %20 = arith.subf %12, %19 : vector<1x256xf32>
    %c0_i32 = arith.constant 0 : i32
    %21 = vector.broadcast %c0_i32 : i32 to vector<1x256xi32>
    %22 = arith.cmpi sge, %3, %21 : vector<1x256xi32>
    %c255_i32 = arith.constant 255 : i32
    %23 = vector.broadcast %c255_i32 : i32 to vector<1x256xi32>
    %24 = arith.cmpi ne, %3, %23 : vector<1x256xi32>
    %25 = arith.andi %22, %24 : vector<1x256xi1>
    %cst_8 = arith.constant 0.000000e+00 : f32
    %26 = vector.broadcast %cst_8 : f32 to vector<1x256xf32>
    %27 = arith.select %25, %20, %26 : vector<1x256xi1>, vector<1x256xf32>
    %28 = vector.shape_cast %27 : vector<1x256xf32> to vector<1x1x256xf32>
    %c0_9 = arith.constant 0 : index
    %c0_10 = arith.constant 0 : index
    %c0_11 = arith.constant 0 : index
    %29 = vector.load %arg4[%c0_9, %c0_10, %c0_11] : memref<1x1x256xf32, #tpu.memory_space<vmem>>, vector<1x1x256xf32>
    tpu.vector_store %arg4[%c0_9, %c0_10, %c0_11], %28 {strides = array<i32>} : memref<1x1x256xf32, #tpu.memory_space<vmem>>, vector<1x1x256xf32>,
    return
  }
  func.func @transform_0(%arg0: i32, %arg1: i32) -> (i32, i32, i32) {
    %c0_i32 = arith.constant 0 : i32
    %c0_i32_0 = arith.constant 0 : i32
    return %arg0, %c0_i32, %arg1 : i32, i32, i32
  }
  func.func @transform_1(%arg0: i32, %arg1: i32) -> (i32, i32, i32) {
    %c0_i32 = arith.constant 0 : i32
    %c0_i32_0 = arith.constant 0 : i32
    return %arg0, %c0_i32, %arg1 : i32, i32, i32
  }
  func.func @transform_2(%arg0: i32, %arg1: i32) -> (i32, i32, i32) {
    %c0_i32 = arith.constant 0 : i32
    %c0_i32_0 = arith.constant 0 : i32
    return %arg0, %c0_i32, %arg1 : i32, i32, i32
  }
}

</mosaic_0001>

<bundles_post_ra>
// kernel: tpu_custom_call.1
= control target key start
LH: loop header
LB: loop body
LE: loop exit
PB: predicated region body
PF: predicated region fallthrough
CT: control target
= control target key end

     0   :  { %7 = vsyncpa [#allocation3], 0  ;;  %s807_s0 = inlined_call_operand.vmem [shape: f32[2,19,256], index: 0, kind: input, shape index: {}]   ;;  %s808_s1 = inlined_call_operand.vmem [shape: s32[2,1,256], index: 1, kind: input, shape index: {}]   ;;  %s809_s2 = inlined_call_operand.hbm [shape: f32[2,1,256], index: 2, kind: output, shape index: {}]  }
   0x1   :  { %9 = vsyncpa [#allocation3 + $0x1], 0  ;;  %s635_s9 = smov 0   ;;  %s637_s10 = smov 0  }
   0x2   :  { %s639_s11 = smov 0   ;;  %s641_s12 = smov 0  }
   0x3   :  { %s643_s13 = smov 0   ;;  %s645_s14 = smov 0  }
   0x4 LB: > { %s453_s15 = sadd.s32 4294967295, %s616_s14   ;;  %s454_s16 = sadd.s32 4294967294, %s616_s14   ;;  %s616_s14 = sphi %s645_s14, %s15_s14   ;;  %s612_s13 = sphi %s643_s13, %s816_s13   ;;  %s608_s12 = sphi %s641_s12, %s815_s12   ;;  %s604_s11 = sphi %s639_s11, %s814_s11   ;;  %s600_s10 = sphi %s637_s10, %s813_s10   ;;  %s596_s9 = sphi %s635_s9, %s812_s9  }
   0x5   : > { %s27_s17 = sadd.s32 1, %s612_s13  ;;  %s92_s18 = sadd.s32 1, %s604_s11 }
   0x6   : > { %p29_p0 = scmp.ge.s32.totalorder %s27_s17, 2  ;;  %p102_p1 = scmp.ne.s32.totalorder %s604_s11, %s600_s10 }
   0x7   : > { %p103_p2 = scmp.eq.s32.totalorder %s453_s15, 1  ;;  %p108_p3 = scmp.ne.s32.totalorder %s600_s10, %s596_s9 }
   0x8   : > { %s818_s17 = smov (%p29_p0, %s27_s17), 0  ;;  %p109_p5 = scmp.eq.s32.totalorder %s454_s16, 1 }
   0x9   : > { %p675_p4 = por %p103_p2, %p102_p1  ;;  %s87_s20 = ssub.s32 %s612_s13, %s818_s17 }
   0xa   : > { %p457_p6 = scmp.ge.s32.totalorder %s616_s14, 1  ;;  %p90_p7 = scmp.eq.s32.totalorder %s87_s20, 0 }
   0xb   : > { %p682_p8 = por %p109_p5, %p108_p3  ;;  %p152_p9 = scmp.lt.s32.totalorder %s616_s14, 3 }
   0xc   : > { %s688_s22 = scalar_select %p90_p7, %s604_s11, %s92_s18  }
   0xd   : > { %p153_p10 = pnand %p457_p6, %p152_p9 }
   0xe   : > { %p187_p11 = scmp.lt.s32.totalorder (!%p153_p10), %s608_s12, 1  ;;  %s183_s4 = sand.u32 (!%p153_p10), 1, %s600_s10  }
   0xf   : > { %156 = sbr.rel (%p153_p10) target bundleno = 122 (0x7a), region = 28  ;;  %s458_s5 = sshll.u32 (!%p153_p10), %s183_s4, 1 }
  0x10   : > { %s466_s6 = sshll.u32 (!%p153_p10), %s608_s12, 5  ;;  %s185_s7 = scalar_lea.vmem (!%p153_p10), [#allocation2], %s458_s5 }
  0x11   : > { %s362_s8 = sshll.u32 (!%p153_p10), %s185_s7, 4  ;;  %s767_s18 = scalar_lea.hbm (!%p153_p10), %s809_s2, %s466_s6  ;;  %s363_s8 = int_to_ptr.vmem [resolvable:$true] %s362_s8 }
  0x12   : > { %s346_s20 = scalar_lea.sflag (!%p153_p10), [#allocation3], %s183_s4 }
  0x14   : > { %s692_s23 = scalar_select %p187_p11, %s608_s12, 1  ;;  %vm213_vm0 = vcmask 1042432   ;;  %v274_v30 = vlaneseq }
  0x15   : > { %s619_s12 = smov [#allocation2]  }
  0x16   : > { %s467_s24 = smul.u32 48, %s692_s23  ;;  %s460_s28 = sshll.u32 %s692_s23, 1  ;;  %v732_v37 = vshrl.u32 %v274_v30, 7  ;;  %vm342_vm10 = vcmp.lt.s32.totalorder %v274_v30, 256 }
  0x17   : > { %s203_s3 = scalar_lea.vmem %s808_s1, %s460_s28  ;;  %s540_s23 = scalar_lea.vmem %s363_s8, 32 }
  0x18   : > { %s194_s27 = scalar_lea.vmem %s807_s0, %s467_s24  ;;  %v280_v38 = vsub.s32 0, %v732_v37  ;;  %v738_v39 = vld [vmem:[%s203_s3] sm:$0x3]  ;;  %v284_v40 = vsub.s32 1, %v732_v37  ;;  %v276_v41 = vadd.s32 8, %v732_v37  ;;  %v277_v43 = vadd.s32 16, %v732_v37  ;;  %p541_p12 = scmp.ne.s32.totalorder %s363_s8, %s540_s23 }
  0x19   : > { %v698_v0 = vld [vmem:[%s194_s27] sm:$0xff]  ;;  %v700_v1 = vld [vmem:[%s194_s27 + $0x8] sm:$0xff]  ;;  %v208_v4 = vld [vmem:[%s194_s27 + $0x10] sm:$0xff]  ;;  %vm318_vm7 = vcmp.ge.s32.totalorder %v738_v39, 0  ;;  %vm319_vm8 = vcmp.ne.s32.totalorder %v738_v39, 255  ;;  %s544_s24 = sshll.u32 %s619_s12, 4  ;;  %s545_s24 = int_to_ptr.vmem [resolvable:$false] %s544_s24 }
  0x1a   : > { %v702_v2 = vld [vmem:[%s194_s27 + $0x20] sm:$0x7]  ;;  %v704_v3 = vld [vmem:[%s194_s27 + $0x28] sm:$0x7]  ;;  %v706_v5 = vld [vmem:[%s194_s27 + $0x18] sm:$0xff]  ;;  %v281_v42 = vrot.slane %v738_v39, %v280_v38  ;;  %v285_v44 = vrot.slane %v738_v39, %v284_v40  ;;  %p542_p13 = pnand %p541_p12, %p675_p4  ;;  %s546_s25 = scalar_lea.vmem %s545_s24, 64 }
  0x1b   : > { %v214_v6 = vsel %vm213_vm0, %v702_v2, -inf  ;;  %v223_v7 = vsel %vm213_vm0, %v704_v3, -inf  ;;  %vm320_vm9 = vmand %vm318_vm7, %vm319_vm8  ;;  %p547_p1 = scmp.lt.s32.totalorder %s363_s8, %s545_s24  ;;  %p548_p2 = scmp.lt.s32.totalorder %s546_s25, %s540_s23 }
  0x1c   : > { %v215_v8 = vmax.f32 %v698_v0, %v214_v6  ;;  %v224_v9 = vmax.f32 %v700_v1, %v223_v7  ;;  %vm286_vm1 = vcmp.eq.s32.totalorder %v732_v37, %v281_v42  ;;  %vm288_vm2 = vcmp.eq.s32.totalorder %v276_v41, %v281_v42  ;;  %p543_p0 = pneg %p542_p13 }
  0x1d   : > { %vm287_vm3 = vcmp.eq.s32.totalorder %v732_v37, %v285_v44  ;;  %vm289_vm4 = vcmp.eq.s32.totalorder %v276_v41, %v285_v44  ;;  %vm290_vm5 = vcmp.eq.s32.totalorder %v277_v43, %v281_v42  ;;  %vm291_vm6 = vcmp.eq.s32.totalorder %v277_v43, %v285_v44  ;;  %p549_p3 = por %p548_p2, %p547_p1 }
  0x1e   : > { %v216_v10 = vmax.f32 %v215_v8, %v208_v4  ;;  %v225_v11 = vmax.f32 %v224_v9, %v706_v5  ;;  %v292_v50 = vsel %vm286_vm1, %v698_v0, 0.0  ;;  %v294_v51 = vsel %vm288_vm2, %v208_v4, 0.0 }
  0x1f   : > { %v293_v54 = vsel %vm287_vm3, %v700_v1, 0.0  ;;  %v295_v55 = vsel %vm289_vm4, %v706_v5, 0.0  ;;  %v296_v56 = vsel %vm290_vm5, %v702_v2, 0.0  ;;  %v297_v59 = vsel %vm291_vm6, %v704_v3, 0.0  ;;  %p550_p5 = pnand %p549_p3, %p543_p0 }
  0x20   : > { %v217_v12 = vrot.slane %v216_v10, 4  ;;  %v226_v13 = vrot.slane %v225_v11, 4  ;;  %v298_v62 = vadd.f32 %v294_v51, %v292_v50 }
  0x22   : > { %v218_v14 = vmax.f32 %v216_v10, %v217_v12  ;;  %v227_v15 = vmax.f32 %v225_v11, %v226_v13 }
  0x24   : > { %v219_v16 = vrot.slane %v218_v14, 2  ;;  %v228_v17 = vrot.slane %v227_v15, 2 }
  0x26   : > { %v220_v18 = vmax.f32 %v218_v14, %v219_v16  ;;  %v229_v19 = vmax.f32 %v227_v15, %v228_v17 }
  0x28   : > { %v221_v20 = vrot.slane %v220_v18, 1  ;;  %v230_v21 = vrot.slane %v229_v19, 1 }
  0x2a   : > { %v715_v22 = vmax.f32 %v220_v18, %v221_v20  ;;  %v717_v23 = vmax.f32 %v229_v19, %v230_v21 }
  0x2c   : > { %v232_v24 = vsub.f32 %v698_v0, %v715_v22  ;;  %v233_v25 = vsub.f32 %v700_v1, %v717_v23  ;;  %v234_v26 = vsub.f32 %v208_v4, %v715_v22  ;;  %v235_v27 = vsub.f32 %v706_v5, %v717_v23 }
  0x2d   : > { %v236_v28 = vsub.f32 %v702_v2, %v715_v22  ;;  %v237_v29 = vsub.f32 %v704_v3, %v717_v23  ;;  %v299_v0 = vsel %vm213_vm0, %v296_v56, 0.0  ;;  %v307_v4 = vadd.f32 %v295_v55, %v293_v54 }
  0x2e   : > { %v238_v31 = vmul.f32 1.442695, %v232_v24  ;;  %v240_v32 = vmul.f32 1.442695, %v233_v25  ;;  %v242_v33 = vmul.f32 1.442695, %v234_v26  ;;  %v300_v8 = vadd.f32 %v299_v0, %v298_v62 }
  0x2f   : > { %v244_v34 = vmul.f32 1.442695, %v235_v27  ;;  %v246_v35 = vmul.f32 1.442695, %v236_v28  ;;  %v248_v36 = vmul.f32 1.442695, %v237_v29 }
  0x30   : > { %524 = vpow2.f32 %v238_v31  ;;  %v308_v1 = vsel %vm213_vm0, %v297_v59, 0.0  ;;  %v301_v3 = vrot.slane %v300_v8, 4  ;;  %v618_v29 = vmov 1966171168  }
  0x31   : > { %526 = vpow2.f32 %v240_v32  ;;  %v309_v9 = vadd.f32 %v308_v1, %v307_v4  ;;  %v325_v31 = vunpack.c.l.s4 %v618_v29 }
  0x32   : > { %528 = vpow2.f32 %v242_v33  ;;  %v302_v18 = vadd.f32 %v301_v3, %v300_v8 }
  0x33   : > { %530 = vpow2.f32 %v244_v34  ;;  %v310_v14 = vrot.slane %v309_v9, 4  ;;  %v326_v40 = vunpack.c.0.s8 %v325_v31 }
  0x34   : > { %532 = vpow2.f32 %v246_v35  ;;  %v303_v21 = vrot.slane %v302_v18, 2 }
  0x35   : > { %534 = vpow2.f32 %v248_v36  ;;  %v311_v20 = vadd.f32 %v310_v14, %v309_v9 }
  0x36   : > { %v304_v25 = vadd.f32 %v303_v21, %v302_v18 }
  0x37   : > { %v312_v24 = vrot.slane %v311_v20, 2 }
  0x38   : > { %v305_v27 = vrot.slane %v304_v25, 1 }
  0x39   : > { %v313_v26 = vadd.f32 %v312_v24, %v311_v20 }
  0x3a   : > { %v306_v35 = vadd.f32 %v305_v27, %v304_v25 }
  0x3b   : > { %v314_v28 = vrot.slane %v313_v26, 1 }
  0x3d   : > { %v525_v45 = vpop.eup %524  ;;  %v315_v38 = vadd.f32 %v314_v28, %v313_v26 }
  0x3e   : > { %v527_v46 = vpop.eup %526 }
  0x3f   : > { %v529_v47 = vpop.eup %528 }
  0x40   : > { %v531_v48 = vpop.eup %530  ;;  %v250_v49 = vadd.f32 %v529_v47, %v525_v45  ;;  %v329_v45 = vsub.s32 %v326_v40, %v732_v37 }
  0x41   : > { %v533_v52 = vpop.eup %532  ;;  %v259_v53 = vadd.f32 %v531_v48, %v527_v46 }
  0x42   : > { %v535_v57 = vpop.eup %534  ;;  %v251_v58 = vsel %vm213_vm0, %v533_v52, 0.0 }
  0x43   : > { %v252_v60 = vadd.f32 %v251_v58, %v250_v49  ;;  %v260_v61 = vsel %vm213_vm0, %v535_v57, 0.0 }
  0x44   : > { %v261_v63 = vadd.f32 %v260_v61, %v259_v53 }
  0x45   : > { %v253_v6 = vrot.slane %v252_v60, 4 }
  0x46   : > { %v262_v7 = vrot.slane %v261_v63, 4 }
  0x47   : > { %v254_v5 = vadd.f32 %v253_v6, %v252_v60 }
  0x48   : > { %v263_v2 = vadd.f32 %v262_v7, %v261_v63 }
  0x49   : > { %v255_v10 = vrot.slane %v254_v5, 2 }
  0x4a   : > { %v264_v11 = vrot.slane %v263_v2, 2 }
  0x4b   : > { %v256_v12 = vadd.f32 %v255_v10, %v254_v5 }
  0x4c   : > { %v265_v13 = vadd.f32 %v264_v11, %v263_v2 }
  0x4d   : > { %v257_v15 = vrot.slane %v256_v12, 1 }
  0x4e   : > { %v266_v16 = vrot.slane %v265_v13, 1 }
  0x4f   : > { %v258_v17 = vadd.f32 %v257_v15, %v256_v12 }
  0x50   : > { %v267_v19 = vadd.f32 %v266_v16, %v265_v13 }
  0x51   : > { %536 = vlog2.f32 %v258_v17 }
  0x52   : > { %538 = vlog2.f32 %v267_v19 }
  0x5e   : > { %v537_v32 = vpop.eup %536 }
  0x5f   : > { %v539_v33 = vpop.eup %538  ;;  %v269_v34 = vmul.f32 0.6931472, %v537_v32 }
  0x60   : > { %v271_v36 = vmul.f32 0.6931472, %v539_v33 }
  0x61   : > { %v272_v41 = vadd.f32 %v269_v34, %v715_v22 }
  0x62   : > { %v273_v42 = vadd.f32 %v271_v36, %v717_v23 }
  0x63   : > { %v316_v43 = vsub.f32 %v272_v41, %v306_v35 }
  0x64   : > { %v317_v44 = vsub.f32 %v273_v42, %v315_v38 }
  0x66   : > { %v323_v46 = vcombine.low %v316_v43, %v317_v44 }
  0x68   : > { %v330_v47 = vrot.slane %v323_v46, %v329_v45 }
  0x6a   : > { %v337_v48 = vrot.slane %v330_v47, %v329_v45 }
  0x6c   : > { %v339_v22 = vsel %vm320_vm9, %v337_v48, 0.0 }
  0x6d   : > { %344 = vst.msk [vmem:[%s185_s7] sm:$0x3] %vm342_vm10, %v339_v22 }
  0x6e   : > { %553 = shalt.err (!%p550_p5)
}
  0x6f   : > { %s554_s26 = scalar_lea.hbm %s767_s18, 32  ;;  %s558_s29 = scalar_lea.hbm %s809_s2, 64 }
  0x70   : > { %p555_p6 = scmp.ne.s32.totalorder %s767_s18, %s554_s26  ;;  %p559_p10 = scmp.lt.s32.totalorder %s767_s18, %s809_s2 }
  0x71   : > { %p560_p11 = scmp.lt.s32.totalorder %s558_s29, %s554_s26 }
  0x72   : > { %p556_p7 = pnand %p555_p6, %p675_p4 }
  0x73   : > { %p561_p12 = por %p560_p11, %p559_p10 }
  0x74   : > { %p557_p9 = pneg %p556_p7 }
  0x76   : > { %p562_p13 = pnand %p561_p12, %p557_p9 }
  0x78   : > { %565 = shalt.err (!%p562_p13)
}
  0x79   : > { %468 = dma.vmem_to_hbm [thread:$0]  (%p675_p4), %s363_s8, 32, %s767_s18, %s346_s20  }
  0x7a PF: > { %p474_p0 = scmp.ge.s32.totalorder %s616_s14, 2  ;;  %s374_s4 = sand.u32 1, %s596_s9  }
  0x7b   : > { %s375_s5 = scalar_lea.sflag [#allocation3], %s374_s4 }
  0x7c   : > { %p471_p1 = pnand %p474_p0, %p682_p8 }
  0x7e   : > { %p472_p2 = pneg %p471_p1 }
  0x80   : > { %591 = dma.done.wait (%p472_p2), %s375_s5, 32  }
  0x81   : > { %593 = vsyncadd (%p472_p2), %s375_s5, 4294967264  ;;  %s15_s14 = sadd.s32 1, %s616_s14   ;;  %s812_s9 = smov %s600_s10 }
  0x82   : > { %p12_p3 = scmp.ge.s32.totalorder %s15_s14, 4   ;;  %s813_s10 = smov %s604_s11 }
  0x83   : > { %s814_s11 = smov %s688_s22  ;;  %s815_s12 = smov %s612_s13 }
  0x84   : > { %s816_s13 = smov %s818_s17  ;;  %14 = sbr.rel (!%p12_p3) target bundleno = 4 (0x4), region = 66 }
  0x89   :  { %380 = vsyncpa [#allocation3], 1 }
  0x8a   :  { %382 = vsyncpa [#allocation3 + $0x1], 1 }

</bundles_post_ra>
